<compile_context>
chip_gen: v7x
topology: tpu7x:2x2x1
jax: 0.10.0
libtpu: 0.0.40
codegen_flags: <defaults>
</compile_context>

<pallas_src>
import functools

import jax
import jax.numpy as jnp
from jax import lax
from jax.experimental import pallas as pl
from jax.experimental.pallas import tpu as pltpu


def _round_up(x, m):
    return ((x + m - 1) // m) * m


def _cdiv(a, b):
    return -(-a // b)


def _vmem_budget():
    """(vmem_limit_bytes, tile-picker budget) derived from the actual chip."""
    try:
        phys = int(pltpu.get_tpu_info().vmem_capacity_bytes)
        if phys <= 0:
            raise ValueError
    except Exception:
        phys = 64 * 1024 * 1024                       # conservative (v7x)
    limit = min((phys * 5) // 8, 96 * 1024 * 1024)    # ~40 MiB v7x, ~80 MiB v5e/v6e
    return limit, (limit * 3) // 4


# ----------------------------------------------------------------------------
# Path A: lane-dense wrapper-side im2col -> pure matmul kernel (fused epilogue)
# ----------------------------------------------------------------------------

def _matmul_epilogue_kernel(lhs_ref, w_ref, shift_ref, o_ref):
    y = jnp.dot(lhs_ref[...], w_ref[...], preferred_element_type=jnp.float32)
    y = y + shift_ref[...]                       # folded BatchNorm shift
    o_ref[...] = jnp.where(y > 0, y, 0.1 * y).astype(o_ref.dtype)   # LeakyReLU


def _pick_tile_m(M, K_pad, co_tile, budget, want=1024):
    """Largest 16-aligned M tile fitting VMEM, with >=2 grid steps for v7x."""
    hi = max(16, min(want, _round_up(M, 16)))
    tile = 16
    for cand in range(16, hi + 1, 16):
        lhs_b = cand * K_pad * 2                 # bf16 LHS block
        out_b = cand * co_tile * 2               # bf16 output block
        y_b = cand * co_tile * 4                 # f32 intermediate
        w_b = K_pad * co_tile * 2
        if 2 * (lhs_b + out_b) + 2 * w_b + y_b <= budget:
            tile = cand
    if M > 16 and _cdiv(M, tile) < 2:            # both v7x TCs get work
        tile = _round_up(_cdiv(M, 2), 16)
    return tile


def _base_conv_matmul_path(x_nchw, weight_oihw, scale, shift, *, ksize, stride,
                           pad, Ho, Wo, vmem_limit, budget):
    N, Cin, H, W = x_nchw.shape
    Cout = weight_oihw.shape[0]
    K = ksize * ksize * Cin
    K_pad = _round_up(K, 128)
    Cp = _round_up(Cout, 128)

    # Lane-dense im2col LHS built in the wrapper (XLA): (N*Ho*Wo, K_pad).
    x_nhwc = jnp.transpose(x_nchw, (0, 2, 3, 1)).astype(jnp.bfloat16)
    x_pad = jnp.pad(x_nhwc, ((0, 0), (pad, pad), (pad, pad), (0, 0)))
    cols = []
    for kh in range(ksize):
        for kw in range(ksize):
            cols.append(lax.slice(
                x_pad, (0, kh, kw, 0),
                (N, kh + (Ho - 1) * stride + 1, kw + (Wo - 1) * stride + 1, Cin),
                (1, stride, stride, 1)))
    lhs = cols[0] if len(cols) == 1 else jnp.concatenate(cols, axis=-1)
    M = N * Ho * Wo
    lhs = lhs.reshape(M, K)

    # Weight rows ordered (kh, kw, cin); BN scale folded into the columns (f32)
    # before the bf16 cast.
    w2d = jnp.transpose(weight_oihw, (2, 3, 1, 0)).reshape(K, Cout)
    w2d = (w2d * scale[None, :]).astype(jnp.bfloat16)
    w2d = jnp.pad(w2d, ((0, K_pad - K), (0, Cp - Cout)))
    shift_p = jnp.pad(shift.astype(jnp.float32), (0, Cp - Cout)).reshape(1, Cp)

    # Keep the whole padded weight resident (n_co == 1) when it fits; otherwise
    # tile Cout with the LHS block resident across co (co innermost).
    if 2 * K_pad * Cp * 2 <= budget // 4:
        co_tile = Cp
    else:
        co_tile = 256 if Cp % 256 == 0 else 128
    n_co = Cp // co_tile

    tile_m = _pick_tile_m(M, K_pad, co_tile, budget)
    n_m = _cdiv(M, tile_m)
    M_pad = n_m * tile_m
    lhs = jnp.pad(lhs, ((0, M_pad - M), (0, K_pad - K)))

    out = pl.pallas_call(
        _matmul_epilogue_kernel,
        out_shape=jax.ShapeDtypeStruct((M_pad, Cp), jnp.bfloat16),
        grid_spec=pltpu.PrefetchScalarGridSpec(
            num_scalar_prefetch=0,
            grid=(n_m, n_co),
            in_specs=[
                pl.BlockSpec((tile_m, K_pad), lambda m, co: (m, 0)),
                pl.BlockSpec((K_pad, co_tile), lambda m, co: (0, co)),
                pl.BlockSpec((1, co_tile), lambda m, co: (0, co)),
            ],
            out_specs=pl.BlockSpec((tile_m, co_tile), lambda m, co: (m, co)),
        ),
        compiler_params=pltpu.CompilerParams(
            dimension_semantics=("parallel", "parallel"),
            vmem_limit_bytes=vmem_limit),
    )(lhs, w2d, shift_p)

    return out[:M, :Cout].reshape(N, Ho, Wo, Cout)


# ----------------------------------------------------------------------------
# Path B: large-Cin, stride-1, k>1 - in-kernel row-tiled conv (k matmuls / tile)
# ----------------------------------------------------------------------------

def _conv_rows_kernel(*refs, ksize, tile_h, Wo, Cin, co_tile, halo_rows):
    if halo_rows > 0:
        x_ref, hx_ref, w_ref, shift_ref, o_ref = refs
    else:
        x_ref, w_ref, shift_ref, o_ref = refs

    xt = x_ref[0]                                     # (rows, Wp, Cin) bf16
    if halo_rows > 0:
        # TODO(synk): read halo rows directly per-tap instead of this copy.
        xt = jnp.concatenate([xt, hx_ref[0, :halo_rows]], axis=0)

    # One matmul per kernel row kh (K = ksize*Cin); f32 accumulation.
    acc = None
    for kh in range(ksize):
        taps = [lax.slice(xt, (kh, kw, 0), (kh + tile_h, kw + Wo, Cin))
                .reshape(tile_h * Wo, Cin) for kw in range(ksize)]
        lhs = taps[0] if ksize == 1 else jnp.concatenate(taps, axis=-1)
        part = jnp.dot(lhs, w_ref[kh], preferred_element_type=jnp.float32)
        acc = part if acc is None else acc + part

    y = acc + shift_ref[...]                          # folded BatchNorm shift
    y = jnp.where(y > 0, y, 0.1 * y)                  # LeakyReLU(0.1)
    o_ref[0] = y.reshape(tile_h, Wo, co_tile).astype(o_ref.dtype)


def _pick_tile_h(Ho, Wp, Wo, Cin, co_tile, ksize, budget):
    """Largest row tile whose double-buffered blocks + temporaries fit VMEM.

    Honest model: minor dim lane-padded to 128, second-minor sublane-packed
    (16 for bf16); includes the concat copy, per-kh LHS, taps and f32 acc."""
    cin_l = _round_up(Cin, 128)
    wp_s = _round_up(Wp, 16)
    wo_s = _round_up(Wo, 16)
    kl_l = _round_up(ksize * Cin, 128)
    w_blk = ksize * _round_up(ksize * Cin, 16) * co_tile * 2
    best, best_aligned = 1, 0
    for th in range(1, Ho + 1):
        rows = th + ksize - 1
        in_b = rows * wp_s * cin_l * 2             # main + halo input blocks
        cat_b = rows * wp_s * cin_l * 2            # concatenated copy
        taps_b = ksize * ksize * th * wo_s * cin_l * 2
        lhs_b = _round_up(th * Wo, 16) * kl_l * 2  # per-kh im2col LHS
        acc_b = _round_up(th * Wo, 8) * co_tile * 4
        out_b = th * wo_s * co_tile * 2            # bf16 output block
        total = 2 * (in_b + out_b) + 2 * w_blk + cat_b + taps_b + lhs_b + acc_b
        if total <= budget:
            best = th
            if (th * Wo) % 8 == 0:                 # free retile before the store
                best_aligned = th
    return best_aligned if best_aligned else best


def _base_conv_rows_path(x_nchw, weight_oihw, scale, shift, *, ksize, pad,
                         Ho, Wo, vmem_limit, budget, tile_h=None):
    N, Cin, H, W = x_nchw.shape
    Cout = weight_oihw.shape[0]
    Cp = _round_up(Cout, 128)
    Wp = W + 2 * pad
    KL = ksize * Cin
    halo = ksize - 1

    # Whole padded weight resident when it fits; else tile Cout (co outer of t).
    if 2 * ksize * KL * Cp * 2 <= budget // 4:
        co_tile = Cp
    else:
        # TODO(synk): prefer co_tile=128 on v5e (4x 128x128 MXUs).
        co_tile = 256 if Cp % 256 == 0 else 128
    n_co = Cp // co_tile

    if tile_h is None:
        tile_h = _pick_tile_h(Ho, Wp, Wo, Cin, co_tile, ksize, budget)
    tile_h = max(1, min(int(tile_h), Ho))
    if N * n_co == 1 and Ho >= 2:
        tile_h = min(tile_h, _cdiv(Ho, 2))        # >=2 grid steps for v7x 2 TCs
    tile_h = min(Ho, max(tile_h, halo))           # halo block needs divisor>=halo
    n_h = _cdiv(Ho, tile_h)

    if n_h == 1:
        tile_h = Ho
        rows_blk = Ho + halo                      # halo folded into the one block
        halo_rows, hb, sb = 0, 0, 0
        rows_needed = Ho + halo
    else:
        rows_blk = tile_h
        halo_rows = halo
        hb = next(d for d in range(halo, tile_h + 1) if tile_h % d == 0)
        sb = tile_h // hb
        rows_needed = n_h * tile_h + hb
    Ho_pad = n_h * tile_h
    bottom_pad = max(0, rows_needed - (H + pad))

    x_nhwc = jnp.transpose(x_nchw, (0, 2, 3, 1)).astype(jnp.bfloat16)
    x_pad = jnp.pad(x_nhwc, ((0, 0), (pad, bottom_pad), (pad, pad), (0, 0)))

    # Weight (kh, kw*cin, Cp); BN scale folded into output columns (f32 first).
    w3d = jnp.transpose(weight_oihw, (2, 3, 1, 0)).reshape(ksize, KL, Cout)
    w3d = (w3d * scale[None, None, :]).astype(jnp.bfloat16)
    w3d = jnp.pad(w3d, ((0, 0), (0, 0), (0, Cp - Cout)))
    shift_p = jnp.pad(shift.astype(jnp.float32), (0, Cp - Cout)).reshape(1, Cp)

    kernel = functools.partial(
        _conv_rows_kernel, ksize=ksize, tile_h=tile_h, Wo=Wo, Cin=Cin,
        co_tile=co_tile, halo_rows=halo_rows)

    in_specs = [pl.BlockSpec((1, rows_blk, Wp, Cin),
                             lambda n, co, t: (n, t, 0, 0))]
    operands = [x_pad]
    if halo_rows > 0:
        in_specs.append(pl.BlockSpec(
            (1, hb, Wp, Cin),
            lambda n, co, t, _sb=sb: (n, (t + 1) * _sb, 0, 0)))
        operands.append(x_pad)
    in_specs += [
        pl.BlockSpec((ksize, KL, co_tile), lambda n, co, t: (0, 0, co)),
        pl.BlockSpec((1, co_tile), lambda n, co, t: (0, co)),
    ]
    operands += [w3d, shift_p]

    out = pl.pallas_call(
        kernel,
        out_shape=jax.ShapeDtypeStruct((N, Ho_pad, Wo, Cp), jnp.bfloat16),
        grid_spec=pltpu.PrefetchScalarGridSpec(
            num_scalar_prefetch=0,
            grid=(N, n_co, n_h),
            in_specs=in_specs,
            out_specs=pl.BlockSpec((1, tile_h, Wo, co_tile),
                                   lambda n, co, t: (n, t, 0, co)),
        ),
        compiler_params=pltpu.CompilerParams(
            dimension_semantics=("parallel", "parallel", "parallel"),
            vmem_limit_bytes=vmem_limit),
    )(*operands)

    return out[:, :Ho, :, :Cout]


# ----------------------------------------------------------------------------
# Public entry point
# ----------------------------------------------------------------------------

def base_conv_forward(x_nchw, weight_oihw, gamma, beta, running_mean,
                      running_var, *, ksize, stride, eps=1e-3, groups=1):
    """BaseConv forward (inference BN). x: (N, Cin, H, W) -> (N, Cout, Ho, Wo)."""
    # TODO(synk): groups > 1 (DWConv-style grouped conv) is not supported here.
    assert groups == 1, "grouped conv not supported"
    N, Cin, H, W = x_nchw.shape
    pad = (ksize - 1) // 2
    Ho = (H + 2 * pad - ksize) // stride + 1
    Wo = (W + 2 * pad - ksize) // stride + 1

    vmem_limit, budget = _vmem_budget()

    # Inference BatchNorm folded to per-channel scale/shift (scale goes into
    # the conv weight, shift is the fused bias).
    scale = (gamma / jnp.sqrt(running_var + eps)).astype(jnp.float32)
    shift = (beta - running_mean * scale).astype(jnp.float32)

    if ksize == 1 or stride > 1 or Cin < 32:
        out_nhwc = _base_conv_matmul_path(
            x_nchw, weight_oihw, scale, shift, ksize=ksize, stride=stride,
            pad=pad, Ho=Ho, Wo=Wo, vmem_limit=vmem_limit, budget=budget)
    else:
        # TODO(synk): add an in-kernel stride>1 variant for very large Cin.
        out_nhwc = _base_conv_rows_path(
            x_nchw, weight_oihw, scale, shift, ksize=ksize, pad=pad,
            Ho=Ho, Wo=Wo, vmem_limit=vmem_limit, budget=budget)

    # NCHW/f32 conversion is API glue to match the PyTorch module; chained
    # BaseConv layers should consume the bf16 NHWC tensor directly instead.
    return jnp.transpose(out_nhwc, (0, 3, 1, 2)).astype(jnp.float32)


def _reference_forward(x_nchw, weight_oihw, gamma, beta, mean, var,
                       *, ksize, stride, eps=1e-3):
    pad = (ksize - 1) // 2
    # Quantize inputs to bf16 (what the kernel consumes) for an apples-to-apples check.
    xq = x_nchw.astype(jnp.bfloat16).astype(jnp.float32)
    wq = weight_oihw.astype(jnp.bfloat16).astype(jnp.float32)
    y = lax.conv_general_dilated(
        xq, wq, window_strides=(stride, stride),
        padding=((pad, pad), (pad, pad)),
        dimension_numbers=("NCHW", "OIHW", "NCHW"))
    scale = (gamma / jnp.sqrt(var + eps)).reshape(1, -1, 1, 1)
    shift = (beta - mean * gamma / jnp.sqrt(var + eps)).reshape(1, -1, 1, 1)
    y = y * scale + shift
    return jnp.where(y > 0, y, 0.1 * y)


if __name__ == "__main__":
    key = jax.random.PRNGKey(0)

    configs = [
        # (N, Cin, Cout, H, W, ksize, stride)
        (2, 4, 8, 16, 16, 3, 1),     # small-Cin 3x3: lane-dense matmul path
        (2, 4, 8, 16, 16, 1, 1),     # 1x1 conv: pure matmul path
        (2, 8, 16, 16, 16, 3, 2),    # stride-2 downsample: matmul path
        (1, 8, 384, 16, 16, 3, 1),   # wide Cout (lane-dense Cp = 384)
        (1, 64, 128, 16, 16, 3, 1),  # large-Cin: in-kernel row-tiled path (halo)
    ]
    for idx, (N, Cin, Cout, H, W, ksize, stride) in enumerate(configs):
        key, k_x, k_w, k_g, k_b, k_m, k_v = jax.random.split(key, 7)
        x = jax.random.normal(k_x, (N, Cin, H, W), jnp.float32)
        w = jax.random.normal(k_w, (Cout, Cin, ksize, ksize), jnp.float32) * 0.1
        gamma = 1.0 + 0.1 * jax.random.normal(k_g, (Cout,), jnp.float32)
        beta = 0.1 * jax.random.normal(k_b, (Cout,), jnp.float32)
        running_mean = 0.1 * jax.random.normal(k_m, (Cout,), jnp.float32)
        running_var = jnp.abs(jax.random.normal(k_v, (Cout,), jnp.float32)) + 0.5

        out = base_conv_forward(x, w, gamma, beta, running_mean, running_var,
                                ksize=ksize, stride=stride)
        out = jax.block_until_ready(out)

        ref = _reference_forward(x, w, gamma, beta, running_mean, running_var,
                                 ksize=ksize, stride=stride)
        pad = (ksize - 1) // 2
        Ho = (H + 2 * pad - ksize) // stride + 1
        Wo = (W + 2 * pad - ksize) // stride + 1
        assert out.shape == (N, Cout, Ho, Wo), (idx, out.shape)
        err = float(jnp.max(jnp.abs(out - ref)))
        assert jnp.allclose(out, ref, atol=2e-2, rtol=2e-2), (idx, err)

    print("KERNEL_OK")
</pallas_src>

<mosaic_0001>
module attributes {stable_mosaic.version = 11 : i64} {
  func.func @_matmul_epilogue_kernel(%arg0: i32, %arg1: i32, %arg2: memref<256x128xbf16, #tpu.memory_space<vmem>>, %arg3: memref<128x128xbf16, #tpu.memory_space<vmem>>, %arg4: memref<1x128xf32, #tpu.memory_space<vmem>>, %arg5: memref<256x128xbf16, #tpu.memory_space<vmem>>) attributes {dimension_semantics = [#tpu.dimension_semantics<parallel>, #tpu.dimension_semantics<parallel>], iteration_bounds = array<i64: 2, 1>, scalar_prefetch = 0 : i64, scratch_operands = 0 : i64, tpu.core_type = #tpu.core_type<tc>, window_params = [{transform_indices = @transform_0, window_bounds = array<i64: 256, 128>}, {transform_indices = @transform_1, window_bounds = array<i64: 128, 128>}, {transform_indices = @transform_2, window_bounds = array<i64: 1, 128>}, {transform_indices = @transform_3, window_bounds = array<i64: 256, 128>}]} {
    %c0 = arith.constant 0 : index
    %c0_0 = arith.constant 0 : index
    %0 = vector.load %arg2[%c0, %c0_0] : memref<256x128xbf16, #tpu.memory_space<vmem>>, vector<256x128xbf16>
    %c0_1 = arith.constant 0 : index
    %c0_2 = arith.constant 0 : index
    %1 = vector.load %arg3[%c0_1, %c0_2] : memref<128x128xbf16, #tpu.memory_space<vmem>>, vector<128x128xbf16>
    %cst = arith.constant dense<0.000000e+00> : vector<256x128xf32>
    %2 = tpu.matmul %0, %1, %cst {dimension_numbers = #tpu.dot_dimension_numbers<[1], [0], [0], [1], [0, 0, 1, 1], [], []>} : vector<256x128xbf16>, vector<128x128xbf16>, vector<256x128xf32> -> vector<256x128xf32>
    %c0_3 = arith.constant 0 : index
    %c0_4 = arith.constant 0 : index
    %3 = vector.load %arg4[%c0_3, %c0_4] : memref<1x128xf32, #tpu.memory_space<vmem>>, vector<1x128xf32>
    %4 = vector.broadcast %3 : vector<1x128xf32> to vector<256x128xf32>
    %5 = arith.addf %2, %4 : vector<256x128xf32>
    %cst_5 = arith.constant 0.000000e+00 : f32
    %6 = vector.broadcast %cst_5 : f32 to vector<256x128xf32>
    %7 = arith.cmpf ogt, %5, %6 : vector<256x128xf32>
    %cst_6 = arith.constant 1.000000e-01 : f32
    %8 = vector.broadcast %cst_6 : f32 to vector<256x128xf32>
    %9 = arith.mulf %8, %5 : vector<256x128xf32>
    %10 = arith.select %7, %5, %9 : vector<256x128xi1>, vector<256x128xf32>
    %11 = arith.truncf %10 : vector<256x128xf32> to vector<256x128xbf16>
    %c0_7 = arith.constant 0 : index
    %c0_8 = arith.constant 0 : index
    %12 = vector.load %arg5[%c0_7, %c0_8] : memref<256x128xbf16, #tpu.memory_space<vmem>>, vector<256x128xbf16>
    tpu.vector_store %arg5[%c0_7, %c0_8], %11 {strides = array<i32>} : memref<256x128xbf16, #tpu.memory_space<vmem>>, vector<256x128xbf16>,
    return
  }
  func.func @transform_0(%arg0: i32, %arg1: i32) -> (i32, i32) {
    %c0_i32 = arith.constant 0 : i32
    %c0_i32_0 = arith.constant 0 : i32
    return %arg0, %c0_i32 : i32, i32
  }
  func.func @transform_1(%arg0: i32, %arg1: i32) -> (i32, i32) {
    %c0_i32 = arith.constant 0 : i32
    %c0_i32_0 = arith.constant 0 : i32
    return %c0_i32, %arg1 : i32, i32
  }
  func.func @transform_2(%arg0: i32, %arg1: i32) -> (i32, i32) {
    %c0_i32 = arith.constant 0 : i32
    %c0_i32_0 = arith.constant 0 : i32
    return %c0_i32, %arg1 : i32, i32
  }
  func.func @transform_3(%arg0: i32, %arg1: i32) -> (i32, i32) {
    %c0_i32 = arith.constant 0 : i32
    return %arg0, %arg1 : i32, i32
  }
}

</mosaic_0001>

<bundles_post_ra>
// kernel: tpu_custom_call.1
= control target key start
LH: loop header
LB: loop body
LE: loop exit
PB: predicated region body
PF: predicated region fallthrough
CT: control target
= control target key end

     0   :  { %8 = vsyncpa [#allocation3], 0  ;;  %s1855_s0 = inlined_call_operand.hbm [shape: bf16[512,128], index: 0, kind: input, shape index: {}]   ;;  %s1856_s1 = inlined_call_operand.hbm [shape: bf16[128,128], index: 1, kind: input, shape index: {}]   ;;  %s1857_s2 = inlined_call_operand.vmem [shape: f32[1,128], index: 2, kind: input, shape index: {}]   ;;  %s1858_s3 = inlined_call_operand.hbm [shape: bf16[512,128], index: 3, kind: output, shape index: {}]  }
   0x1   :  { %10 = vsyncpa [#allocation3 + $0x1], 0 }
   0x2   :  { %11 = vsyncpa [#allocation6], 0 }
   0x3   :  { %12 = vsyncpa [#allocation4], 0 }
   0x4   :  { %14 = vsyncpa [#allocation4 + $0x1], 0  ;;  %s1546_s12 = smov 0   ;;  %s1548_s13 = smov 0  }
   0x5   :  { %s1550_s14 = smov 0   ;;  %s1552_s15 = smov 0  }
   0x6   :  { %s1554_s16 = smov 0   ;;  %s1556_s17 = smov 0  }
   0x7 LB: > { %s980_s18 = sadd.s32 4294967295, %s1517_s17   ;;  %s981_s19 = sadd.s32 4294967294, %s1517_s17   ;;  %s1517_s17 = sphi %s1556_s17, %s20_s17   ;;  %s1513_s16 = sphi %s1554_s16, %s1882_s16   ;;  %s1509_s15 = sphi %s1552_s15, %s1881_s15   ;;  %s1505_s14 = sphi %s1550_s14, %s1880_s14   ;;  %s1501_s13 = sphi %s1548_s13, %s1879_s13   ;;  %s1497_s12 = sphi %s1546_s12, %s1878_s12  }
   0x8   : > { %p52_p0 = scmp.ne.s32.totalorder %s1501_s13, %s1497_s12  ;;  %p1580_p1 = scmp.eq.s32.totalorder %s980_s18, 0 }
   0x9   : > { %p1584_p2 = scmp.eq.s32.totalorder %s980_s18, 1  ;;  %p136_p3 = scmp.eq.s32.totalorder %s981_s19, 1 }
   0xa   : > { %s1863_s20 = scalar_select %p1580_p1, 1, 0 }
   0xb   : > { %s1864_s21 = scalar_select %p1584_p2, 1, 0 }
   0xc   : > { %p1590_p4 = por %p1580_p1, %p52_p0  ;;  %p982_p5 = scmp.ge.s32.totalorder %s1517_s17, 1 }
   0xd   : > { %p1595_p6 = por %p136_p3, %p52_p0  ;;  %p143_p7 = scmp.lt.s32.totalorder %s1517_s17, 3 }
   0xe   : > { %s1865_s22 = scalar_select %p1590_p4, 1, 0 }
   0xf   : > { %s1866_s23 = scalar_select %p1595_p6, 1, 0 }
  0x10   : > { %p1600_p8 = pnand %p982_p5, %p143_p7  ;;  %s1519_s25 = smov [#allocation5]  }
  0x11   : > { %s157_s26 = sshll.u32 %s1519_s25, 4  ;;  %s32_s28 = sadd.s32 1, %s1513_s16  ;;  %s158_s26 = int_to_ptr.vmem [resolvable:$true] %s157_s26 }
  0x12   : > { %s1867_s24 = scalar_select %p1600_p8, 1, 0 }
  0x13   : > { %p1280_p9 = pneg %p1600_p8  ;;  %s1373_s4 = scalar_lea.hbm %s1856_s1, 1024 }
  0x14   : > { %p1374_p12 = scmp.ne.s32.totalorder %s1856_s1, %s1373_s4  ;;  %p1380_p5 = scmp.lt.u32.totalorder %s1373_s4, %s1856_s1 }
  0x15   : > { %p1609_p11 = pnand %p1280_p9, %p1580_p1 }
  0x17   : > { %p1375_p13 = pneg %p1609_p11 }
  0x19   : > { %p1376_p0 = pnand %p1375_p13, %p1374_p12 }
  0x1b   : > { %p1377_p3 = pneg %p1376_p0 }
  0x1d   : > { %p1382_p7 = pnand %p1380_p5, %p1377_p3 }
  0x1f   : > { %1385 = shalt.err (!%p1382_p7)
}
  0x20   : > { %s1386_s9 = scalar_lea.vmem %s158_s26, 1024  ;;  %p1394_p1 = scmp.lt.s32.totalorder %s158_s26, %s158_s26 }
  0x21   : > { %p1387_p9 = scmp.ne.s32.totalorder %s158_s26, %s1386_s9  ;;  %p1395_p4 = scmp.lt.s32.totalorder %s1386_s9, %s1386_s9 }
  0x23   : > { %p1389_p10 = pnand %p1387_p9, %p1375_p13  ;;  %p1396_p8 = por %p1395_p4, %p1394_p1 }
  0x25   : > { %p1390_p6 = pneg %p1389_p10 }
  0x27   : > { %p1397_p2 = pnand %p1396_p8, %p1390_p6 }
  0x29   : > { %1400 = shalt.err (!%p1397_p2)
}
  0x2a   : > { %s1520_s10 = smov 64   ;;  %s1521_s11 = smov 4  }
  0x2b   : > { %1283 = dma.hbm_to_vmem [thread:$0]  (!%p1609_p11), %s1856_s1, 1024, %s158_s26, [#allocation6], %s1520_s10, %s1520_s10, %s1521_s11  }
  0x2c   : > { %p34_p1 = scmp.ge.s32.totalorder %s32_s28, 2  ;;  %s39_s25 = sadd.s32 1, %s1505_s14 }
  0x2d   : > { %p46_p2 = scmp.ne.s32.totalorder %s1505_s14, %s1501_s13  ;;  %p47_p4 = scmp.eq.s32.totalorder %s1517_s17, 0 }
  0x2e   : > { %s1884_s28 = smov (%p34_p1, %s32_s28), 0  ;;  %p1870_p8 = scmp.ne.s32.totalorder %s1864_s21, 0 }
  0x2f   : > { %p1639_p6 = por %p47_p4, %p46_p2  ;;  %s36_s30 = ssub.s32 %s1513_s16, %s1884_s28 }
  0x30   : > { %p1645_p10 = por %p1870_p8, %p46_p2  ;;  %p1293_p12 = scmp.lt.s32.totalorder %s1517_s17, 2 }
  0x31   : > { %p37_p11 = scmp.eq.s32.totalorder %s36_s30, 0  ;;  %s177_s26 = sand.u32 1, %s1505_s14  }
  0x32   : > { %s986_s4 = sshll.u32 %s177_s26, 7  ;;  %s1055_s6 = sshll.u32 %s1513_s16, 11 }
  0x33   : > { %s1654_s5 = scalar_select %p37_p11, %s1505_s14, %s39_s25  }
  0x34   : > { %s1660_s9 = scalar_lea.hbm %s1855_s0, %s1055_s6  ;;  %s181_s21 = scalar_lea.vmem [#allocation2], %s986_s4 }
  0x35   : > { %s188_s18 = sshll.u32 %s181_s21, 4  ;;  %p1666_p13 = pnand %p1293_p12, %p1639_p6  ;;  %s1662_s18 = int_to_ptr.vmem [resolvable:$true] %s188_s18 }
  0x36   : > { %s1670_s25 = scalar_lea.sflag [#allocation3], %s177_s26  ;;  %s1401_s30 = scalar_lea.hbm %s1660_s9, 2048 }
  0x37   : > { %p1402_p0 = scmp.ne.s32.totalorder %s1660_s9, %s1401_s30  ;;  %p1403_p3 = pneg %p1666_p13 }
  0x38   : > { %s1406_s29 = scalar_lea.hbm %s1855_s0, 4096  ;;  %p1407_p9 = scmp.lt.u32.totalorder %s1660_s9, %s1855_s0 }
  0x39   : > { %p1404_p5 = pnand %p1403_p3, %p1402_p0  ;;  %p1408_p1 = scmp.lt.u32.totalorder %s1406_s29, %s1401_s30 }
  0x3a   : > { %p1410_p4 = scmp.lt.u32.totalorder %s1401_s30, %s1660_s9 }
  0x3b   : > { %p1405_p7 = pneg %p1404_p5  ;;  %p1409_p2 = por %p1408_p1, %p1407_p9 }
  0x3d   : > { %p1411_p6 = por %p1410_p4, %p1409_p2 }
  0x3f   : > { %p1412_p8 = pnand %p1411_p6, %p1405_p7 }
  0x41   : > { %1415 = shalt.err (!%p1412_p8)
}
  0x42   : > { %s1416_s26 = scalar_lea.vmem %s1662_s18, 2048  ;;  %s1522_s21 = smov [#allocation2]  }
  0x43   : > { %p1417_p12 = scmp.ne.s32.totalorder %s1662_s18, %s1416_s26  ;;  %s1421_s4 = sshll.u32 %s1522_s21, 4  ;;  %s1422_s4 = int_to_ptr.vmem [resolvable:$false] %s1421_s4 }
  0x44   : > { %s1423_s6 = scalar_lea.vmem %s1422_s4, 4096  ;;  %p1424_p5 = scmp.lt.s32.totalorder %s1662_s18, %s1422_s4 }
  0x45   : > { %p1419_p11 = pnand %p1417_p12, %p1403_p3  ;;  %p1425_p9 = scmp.lt.s32.totalorder %s1423_s6, %s1416_s26 }
  0x47   : > { %p1420_p0 = pneg %p1419_p11  ;;  %p1426_p1 = por %p1425_p9, %p1424_p5 }
  0x49   : > { %p1427_p2 = pnand %p1426_p1, %p1420_p0 }
  0x4b   : > { %1430 = shalt.err (!%p1427_p2)
}
  0x4c   : > { %1287 = dma.hbm_to_vmem [thread:$0]  (!%p1666_p13), %s1660_s9, 2048, %s1662_s18, %s1670_s25, %s1520_s10, %s1520_s10, %s1521_s11  }
  0x4d   : > { %p1873_p3 = scmp.ne.s32.totalorder %s1867_s24, 0 }
  0x4e   : > { %s1704_s30 = sand.u32 (!%p1873_p3), 1, %s1501_s13   ;;  %p1874_p7 = scmp.ne.s32.totalorder (!%p1873_p3), %s1865_s22, 0 }
  0x4f   : > { %200 = sbr.rel (%p1873_p3) target bundleno = 392 (0x188), region = 32  ;;  %s990_s29 = sshll.u32 (!%p1873_p3), %s1704_s30, 7 }
  0x50   : > { %s203_s7 = scalar_lea.sflag (!%p1873_p3), [#allocation3], %s1704_s30  ;;  %s1710_s19 = scalar_lea.vmem (!%p1873_p3), [#allocation2], %s990_s29 }
  0x56   : > { %1484 = dma.done.wait (%p1874_p7), %s203_s7, 2048  }
  0x57   : > { %1486 = vsyncadd (%p1874_p7), %s203_s7, 4294965248  ;;  %p1875_p13 = scmp.ne.s32.totalorder %s1863_s20, 0 }
  0x59   : > { %1488 = dma.done.wait (%p1875_p13), [#allocation6], 1024  }
  0x5a   : > { %1490 = vsyncadd (%p1875_p13), [#allocation6], 4294966272  ;;  %v1349_v0 = vld [vmem:[#allocation5] sm:$0xff]   ;;  %v1350_v1 = vld [vmem:[#allocation5 + $0x8] sm:$0xff]   ;;  %s1755_s24 = scalar_lea.vmem [#allocation7], %s990_s29  ;;  %s1088_s10 = sshll.u32 %s1509_s15, 11 }
  0x5b   : > { %1208 = vmatprep.subr.bf16.mxu0 %v1349_v0  ;;  %1256 = vmatprep.subr.bf16.mxu1 %v1349_v0  ;;  %v1351_v2 = vld [vmem:[#allocation5 + $0x10] sm:$0xff]   ;;  %v1352_v3 = vld [vmem:[#allocation5 + $0x18] sm:$0xff]   ;;  %v1357_v4 = vld [vmem:[%s1710_s19] sm:$0xff]   ;;  %s873_s11 = sshll.u32 %s1755_s24, 4  ;;  %s1803_s25 = scalar_lea.hbm %s1858_s3, %s1088_s10  ;;  %s1805_s11 = int_to_ptr.vmem [resolvable:$true] %s873_s11 }
  0x5c   : > { %1209 = vmatpush3.bf16.msra.mxu0 %v1349_v0  ;;  %1264 = vmatpush3.bf16.msra.mxu1 %v1349_v0  ;;  %v1358_v5 = vld [vmem:[%s1710_s19 + $0x40] sm:$0xff]   ;;  %v1354_v7 = vld [vmem:[#allocation5 + $0x28] sm:$0xff]   ;;  %v1355_v8 = vld [vmem:[#allocation5 + $0x30] sm:$0xff]   ;;  %s859_s15 = scalar_lea.sflag [#allocation4], %s1704_s30  ;;  %s1431_s8 = scalar_lea.vmem %s1805_s11, 2048 }
  0x5d   : > { %1210 = vmatprep.subr.bf16.mxu0 %v1350_v1  ;;  %1257 = vmatprep.subr.bf16.mxu1 %v1350_v1  ;;  %v1353_v6 = vld [vmem:[#allocation5 + $0x20] sm:$0xff]   ;;  %v1356_v9 = vld [vmem:[#allocation5 + $0x38] sm:$0xff]   ;;  %v1359_v10 = vld [vmem:[%s1710_s19 + $0x8] sm:$0xff]   ;;  %p1432_p4 = scmp.ne.s32.totalorder %s1805_s11, %s1431_s8  ;;  %s1523_s26 = smov [#allocation7]  }
  0x5e   : > { %1224 = vmatprep.mubr.bf16.mxu0 %v1357_v4  ;;  %1240 = vmatprep.mubr.bf16.mxu1 %v1358_v5  ;;  %v1360_v11 = vld [vmem:[%s1710_s19 + $0x48] sm:$0xff]   ;;  %v1361_v12 = vld [vmem:[%s1710_s19 + $0x10] sm:$0xff]   ;;  %v1363_v14 = vld [vmem:[%s1710_s19 + $0x18] sm:$0xff]   ;;  %s1435_s21 = sshll.u32 %s1523_s26, 4  ;;  %s1436_s21 = int_to_ptr.vmem [resolvable:$false] %s1435_s21 }
  0x5f   : > { %v1362_v13 = vld [vmem:[%s1710_s19 + $0x50] sm:$0xff]   ;;  %v1364_v15 = vld [vmem:[%s1710_s19 + $0x58] sm:$0xff]   ;;  %v1365_v16 = vld [vmem:[%s1710_s19 + $0x20] sm:$0xff]   ;;  %p1433_p6 = pnand %p1432_p4, %p1645_p10  ;;  %s1437_s4 = scalar_lea.vmem %s1436_s21, 4096 }
  0x60   : > { %1211 = vmatpush3.bf16.msra.mxu0 %v1350_v1  ;;  %1265 = vmatpush3.bf16.msra.mxu1 %v1350_v1  ;;  %v1366_v17 = vld [vmem:[%s1710_s19 + $0x60] sm:$0xff]   ;;  %v1367_v18 = vld [vmem:[%s1710_s19 + $0x28] sm:$0xff]   ;;  %v1369_v20 = vld [vmem:[%s1710_s19 + $0x30] sm:$0xff]   ;;  %p1438_p12 = scmp.lt.s32.totalorder %s1805_s11, %s1436_s21  ;;  %p1439_p11 = scmp.lt.s32.totalorder %s1437_s4, %s1431_s8 }
  0x61   : > { %1212 = vmatprep.subr.bf16.mxu0 %v1351_v2  ;;  %1258 = vmatprep.subr.bf16.mxu1 %v1351_v2  ;;  %v1368_v19 = vld [vmem:[%s1710_s19 + $0x68] sm:$0xff]   ;;  %v1370_v21 = vld [vmem:[%s1710_s19 + $0x70] sm:$0xff]   ;;  %v1371_v22 = vld [vmem:[%s1710_s19 + $0x38] sm:$0xff]   ;;  %p1434_p8 = pneg %p1433_p6 }
  0x62   : > { %v1372_v23 = vld [vmem:[%s1710_s19 + $0x78] sm:$0xff]   ;;  %v1739_v24 = vld [vmem:[%s1857_s2] ss:$0 sm:$0xff]  ;;  %p1440_p0 = por %p1439_p11, %p1438_p12 }
  0x64   : > { %1213 = vmatpush3.bf16.msra.mxu0 %v1351_v2  ;;  %1266 = vmatpush3.bf16.msra.mxu1 %v1351_v2  ;;  %p1441_p5 = pnand %p1440_p0, %p1434_p8 }
  0x65   : > { %1214 = vmatprep.subr.bf16.mxu0 %v1352_v3  ;;  %1259 = vmatprep.subr.bf16.mxu1 %v1352_v3 }
  0x68   : > { %1215 = vmatpush3.bf16.msra.mxu0 %v1352_v3  ;;  %1267 = vmatpush3.bf16.msra.mxu1 %v1352_v3 }
  0x69   : > { %1216 = vmatprep.subr.bf16.mxu0 %v1353_v6  ;;  %1260 = vmatprep.subr.bf16.mxu1 %v1353_v6 }
  0x6c   : > { %1217 = vmatpush3.bf16.msra.mxu0 %v1353_v6  ;;  %1268 = vmatpush3.bf16.msra.mxu1 %v1353_v6 }
  0x6d   : > { %1218 = vmatprep.subr.bf16.mxu0 %v1354_v7  ;;  %1261 = vmatprep.subr.bf16.mxu1 %v1354_v7 }
  0x70   : > { %1219 = vmatpush3.bf16.msra.mxu0 %v1354_v7  ;;  %1269 = vmatpush3.bf16.msra.mxu1 %v1354_v7 }
  0x71   : > { %1220 = vmatprep.subr.bf16.mxu0 %v1355_v8  ;;  %1262 = vmatprep.subr.bf16.mxu1 %v1355_v8 }
  0x74   : > { %1221 = vmatpush3.bf16.msra.mxu0 %v1355_v8  ;;  %1270 = vmatpush3.bf16.msra.mxu1 %v1355_v8 }
  0x75   : > { %1222 = vmatprep.subr.bf16.mxu0 %v1356_v9  ;;  %1263 = vmatprep.subr.bf16.mxu1 %v1356_v9 }
  0x78   : > { %1223 = vmatpush3.bf16.msra.mxu0 %v1356_v9  ;;  %1271 = vmatpush3.bf16.msra.mxu1 %v1356_v9 }
  0x7b   : > { %1225 = vmatmul.mubr.bf16.vlgmr.msra.gmra.mrb[0].mxu0 %v1359_v10  ;;  %1241 = vmatmul.mubr.bf16.vlgmr.msra.gmra.mrb[0].mxu1 %v1360_v11 }
  0x7c   : > { %1228 = vmatprep.mubr.bf16.mxu0 %v1361_v12  ;;  %1244 = vmatprep.mubr.bf16.mxu1 %v1362_v13 }
  0x83   : > { %1229 = vmatmul.mubr.bf16.gmra.mrb[4].mxu0 %v1363_v14  ;;  %1245 = vmatmul.mubr.bf16.gmra.mrb[4].mxu1 %v1364_v15 }
  0x84   : > { %1232 = vmatprep.mubr.bf16.mxu0 %v1365_v16  ;;  %1248 = vmatprep.mubr.bf16.mxu1 %v1366_v17 }
  0x8b   : > { %1233 = vmatmul.mubr.bf16.gmra.mrb[8].mxu0 %v1367_v18  ;;  %1249 = vmatmul.mubr.bf16.gmra.mrb[8].mxu1 %v1368_v19 }
  0x8c   : > { %1236 = vmatprep.mubr.bf16.mxu0 %v1369_v20  ;;  %1252 = vmatprep.mubr.bf16.mxu1 %v1370_v21 }
  0x93   : > { %1237 = vmatmul.mubr.bf16.gmra.mrb[12].mxu0 %v1371_v22  ;;  %1253 = vmatmul.mubr.bf16.gmra.mrb[12].mxu1 %v1372_v23 }
 0x14e   : > { %v1226_v25 = vpop.f32.mrb[0].mxu0  ;;  %v1242_v26 = vpop.f32.mrb[0].mxu1 }
 0x14f   : > { %v484_v27 = vadd.f32 %v1226_v25, %v1739_v24  ;;  %v548_v28 = vadd.f32 %v1242_v26, %v1739_v24  ;;  %v475_v29 = vpop.f32.mrb[1].mxu0  ;;  %v539_v30 = vpop.f32.mrb[1].mxu1 }
 0x150   : > { %v476_v31 = vadd.f32 %v1739_v24, %v475_v29  ;;  %v540_v32 = vadd.f32 %v1739_v24, %v539_v30  ;;  %v1227_v33 = vpop.f32.mrb[2].mxu0  ;;  %v1243_v34 = vpop.f32.mrb[2].mxu1 }
 0x151   : > { %vm604_vm0 = vcmp.gt.f32.partialorder %v484_v27, 0.0  ;;  %v636_v35 = vmul.f32 0.1, %v484_v27  ;;  %vm620_vm1 = vcmp.gt.f32.partialorder %v548_v28, 0.0  ;;  %v652_v36 = vmul.f32 0.1, %v548_v28 }
 0x152   : > { %vm602_vm2 = vcmp.gt.f32.partialorder %v476_v31, 0.0  ;;  %v634_v37 = vmul.f32 0.1, %v476_v31  ;;  %vm618_vm3 = vcmp.gt.f32.partialorder %v540_v32, 0.0  ;;  %v650_v38 = vmul.f32 0.1, %v540_v32 }
 0x153   : > { %v487_v39 = vadd.f32 %v1227_v33, %v1739_v24  ;;  %v551_v40 = vadd.f32 %v1243_v34, %v1739_v24  ;;  %v478_v41 = vpop.f32.mrb[3].mxu0  ;;  %v542_v42 = vpop.f32.mrb[3].mxu1  ;;  %v668_v43 = vsel %vm604_vm0, %v484_v27, %v636_v35  ;;  %v684_v44 = vsel %vm620_vm1, %v548_v28, %v652_v36 }
 0x154   : > { %v479_v45 = vadd.f32 %v1739_v24, %v478_v41  ;;  %v543_v46 = vadd.f32 %v1739_v24, %v542_v42  ;;  %v666_v51 = vsel %vm602_vm2, %v476_v31, %v634_v37  ;;  %v682_v52 = vsel %vm618_vm3, %v540_v32, %v650_v38 }
 0x155   : > { %vm605_vm4 = vcmp.gt.f32.partialorder %v487_v39, 0.0  ;;  %v637_v47 = vmul.f32 0.1, %v487_v39  ;;  %vm621_vm5 = vcmp.gt.f32.partialorder %v551_v40, 0.0  ;;  %v653_v48 = vmul.f32 0.1, %v551_v40 }
 0x156   : > { %vm603_vm6 = vcmp.gt.f32.partialorder %v479_v45, 0.0  ;;  %v635_v49 = vmul.f32 0.1, %v479_v45  ;;  %vm619_vm7 = vcmp.gt.f32.partialorder %v543_v46, 0.0  ;;  %v651_v50 = vmul.f32 0.1, %v543_v46 }
 0x157   : > { %v669_v53 = vsel %vm605_vm4, %v487_v39, %v637_v47  ;;  %v685_v54 = vsel %vm621_vm5, %v551_v40, %v653_v48  ;;  %v1230_v55 = vpop.f32.mrb[4].mxu0  ;;  %v1246_v56 = vpop.f32.mrb[4].mxu1 }
 0x158   : > { %v1097_v57 = vpack.c.bf16 %v669_v53, %v668_v43  ;;  %v1137_v58 = vpack.c.bf16 %v685_v54, %v684_v44  ;;  %v667_v59 = vsel %vm603_vm6, %v479_v45, %v635_v49  ;;  %v683_v60 = vsel %vm619_vm7, %v543_v46, %v651_v50  ;;  %v491_v61 = vpop.f32.mrb[5].mxu0  ;;  %v555_v62 = vpop.f32.mrb[5].mxu1 }
 0x159   : > { %v1092_v63 = vpack.c.bf16 %v667_v59, %v666_v51  ;;  %v1132_v0 = vpack.c.bf16 %v683_v60, %v682_v52  ;;  %v500_v1 = vadd.f32 %v1230_v55, %v1739_v24  ;;  %v564_v2 = vadd.f32 %v1246_v56, %v1739_v24  ;;  %v1231_v3 = vpop.f32.mrb[6].mxu0  ;;  %v1247_v4 = vpop.f32.mrb[6].mxu1 }
 0x15a   : > { %1169 = vst [vmem:[%s1755_s24 + $0x8] sm:$0xff] %v1097_v57   ;;  %1177 = vst [vmem:[%s1755_s24 + $0x48] sm:$0xff] %v1137_v58   ;;  %v492_v5 = vadd.f32 %v1739_v24, %v491_v61  ;;  %v556_v6 = vadd.f32 %v1739_v24, %v555_v62  ;;  %v503_v7 = vadd.f32 %v1231_v3, %v1739_v24  ;;  %v494_v9 = vpop.f32.mrb[7].mxu0  ;;  %v558_v10 = vpop.f32.mrb[7].mxu1 }
 0x15b   : > { %v567_v8 = vadd.f32 %v1247_v4, %v1739_v24  ;;  %1093 = vst [vmem:[%s1755_s24] sm:$0xff] %v1092_v63   ;;  %1176 = vst [vmem:[%s1755_s24 + $0x40] sm:$0xff] %v1132_v0   ;;  %vm608_vm8 = vcmp.gt.f32.partialorder %v500_v1, 0.0  ;;  %v640_v11 = vmul.f32 0.1, %v500_v1  ;;  %vm624_vm9 = vcmp.gt.f32.partialorder %v564_v2, 0.0 }
 0x15c   : > { %v656_v12 = vmul.f32 0.1, %v564_v2  ;;  %vm606_vm10 = vcmp.gt.f32.partialorder %v492_v5, 0.0  ;;  %v638_v13 = vmul.f32 0.1, %v492_v5  ;;  %vm622_vm11 = vcmp.gt.f32.partialorder %v556_v6, 0.0 }
 0x15d   : > { %v672_v14 = vsel %vm608_vm8, %v500_v1, %v640_v11  ;;  %v654_v15 = vmul.f32 0.1, %v556_v6  ;;  %vm609_vm12 = vcmp.gt.f32.partialorder %v503_v7, 0.0  ;;  %v641_v16 = vmul.f32 0.1, %v503_v7 }
 0x15e   : > { %v688_v17 = vsel %vm624_vm9, %v564_v2, %v656_v12  ;;  %v670_v18 = vsel %vm606_vm10, %v492_v5, %v638_v13  ;;  %vm625_vm13 = vcmp.gt.f32.partialorder %v567_v8, 0.0  ;;  %v657_v19 = vmul.f32 0.1, %v567_v8  ;;  %v1234_v20 = vpop.f32.mrb[8].mxu0  ;;  %v1250_v21 = vpop.f32.mrb[8].mxu1 }
 0x15f   : > { %v673_v22 = vsel %vm609_vm12, %v503_v7, %v641_v16  ;;  %v495_v23 = vadd.f32 %v1739_v24, %v494_v9  ;;  %v559_v25 = vadd.f32 %v1739_v24, %v558_v10  ;;  %v516_v26 = vadd.f32 %v1234_v20, %v1739_v24  ;;  %v507_v27 = vpop.f32.mrb[9].mxu0  ;;  %v571_v28 = vpop.f32.mrb[9].mxu1 }
 0x160   : > { %v1107_v29 = vpack.c.bf16 %v673_v22, %v672_v14  ;;  %v689_v30 = vsel %vm625_vm13, %v567_v8, %v657_v19  ;;  %v580_v31 = vadd.f32 %v1250_v21, %v1739_v24  ;;  %v508_v32 = vadd.f32 %v1739_v24, %v507_v27  ;;  %v1235_v33 = vpop.f32.mrb[10].mxu0  ;;  %v1251_v34 = vpop.f32.mrb[10].mxu1 }
 0x161   : > { %v1147_v35 = vpack.c.bf16 %v689_v30, %v688_v17  ;;  %vm607_vm14 = vcmp.gt.f32.partialorder %v495_v23, 0.0  ;;  %v639_v36 = vmul.f32 0.1, %v495_v23  ;;  %vm623_vm15 = vcmp.gt.f32.partialorder %v559_v25, 0.0  ;;  %v510_v37 = vpop.f32.mrb[11].mxu0  ;;  %v574_v38 = vpop.f32.mrb[11].mxu1 }
 0x162   : > { %1171 = vst [vmem:[%s1755_s24 + $0x18] sm:$0xff] %v1107_v29   ;;  %v655_v39 = vmul.f32 0.1, %v559_v25  ;;  %vm612_vm0 = vcmp.gt.f32.partialorder %v516_v26, 0.0  ;;  %v644_v40 = vmul.f32 0.1, %v516_v26  ;;  %v686_v41 = vsel %vm622_vm11, %v556_v6, %v654_v15 }
 0x163   : > { %vm628_vm1 = vcmp.gt.f32.partialorder %v580_v31, 0.0  ;;  %1179 = vst [vmem:[%s1755_s24 + $0x58] sm:$0xff] %v1147_v35   ;;  %v671_v42 = vsel %vm607_vm14, %v495_v23, %v639_v36  ;;  %v660_v43 = vmul.f32 0.1, %v580_v31  ;;  %vm610_vm2 = vcmp.gt.f32.partialorder %v508_v32, 0.0 }
 0x164   : > { %v1102_v44 = vpack.c.bf16 %v671_v42, %v670_v18  ;;  %v687_v45 = vsel %vm623_vm15, %v559_v25, %v655_v39  ;;  %v642_v46 = vmul.f32 0.1, %v508_v32  ;;  %v572_v47 = vadd.f32 %v1739_v24, %v571_v28 }
 0x165   : > { %v1142_v48 = vpack.c.bf16 %v687_v45, %v686_v41  ;;  %v676_v49 = vsel %vm612_vm0, %v516_v26, %v644_v40  ;;  %v692_v50 = vsel %vm628_vm1, %v580_v31, %v660_v43  ;;  %v519_v51 = vadd.f32 %v1235_v33, %v1739_v24 }
 0x166   : > { %1170 = vst [vmem:[%s1755_s24 + $0x10] sm:$0xff] %v1102_v44   ;;  %vm626_vm3 = vcmp.gt.f32.partialorder %v572_v47, 0.0  ;;  %v658_v52 = vmul.f32 0.1, %v572_v47  ;;  %v583_v53 = vadd.f32 %v1251_v34, %v1739_v24  ;;  %v511_v54 = vadd.f32 %v1739_v24, %v510_v37  ;;  %v1238_v55 = vpop.f32.mrb[12].mxu0  ;;  %v1254_v56 = vpop.f32.mrb[12].mxu1 }
 0x167   : > { %1178 = vst [vmem:[%s1755_s24 + $0x50] sm:$0xff] %v1142_v48   ;;  %vm613_vm4 = vcmp.gt.f32.partialorder %v519_v51, 0.0  ;;  %v645_v57 = vmul.f32 0.1, %v519_v51  ;;  %v575_v58 = vadd.f32 %v1739_v24, %v574_v38  ;;  %v532_v59 = vadd.f32 %v1238_v55, %v1739_v24  ;;  %v523_v60 = vpop.f32.mrb[13].mxu0  ;;  %v587_v61 = vpop.f32.mrb[13].mxu1 }
 0x168   : > { %v674_v62 = vsel %vm610_vm2, %v508_v32, %v642_v46  ;;  %vm629_vm5 = vcmp.gt.f32.partialorder %v583_v53, 0.0  ;;  %v661_v63 = vmul.f32 0.1, %v583_v53  ;;  %vm611_vm6 = vcmp.gt.f32.partialorder %v511_v54, 0.0  ;;  %v1239_v0 = vpop.f32.mrb[14].mxu0  ;;  %v1255_v1 = vpop.f32.mrb[14].mxu1 }
 0x169   : > { %v677_v2 = vsel %vm613_vm4, %v519_v51, %v645_v57  ;;  %v643_v3 = vmul.f32 0.1, %v511_v54  ;;  %vm627_vm7 = vcmp.gt.f32.partialorder %v575_v58, 0.0  ;;  %v659_v4 = vmul.f32 0.1, %v575_v58  ;;  %v526_v5 = vpop.f32.mrb[15].mxu0 }
 0x16a   : > { %v690_v6 = vsel %vm626_vm3, %v572_v47, %v658_v52  ;;  %v1117_v7 = vpack.c.bf16 %v677_v2, %v676_v49  ;;  %v693_v8 = vsel %vm629_vm5, %v583_v53, %v661_v63  ;;  %v648_v9 = vmul.f32 0.1, %v532_v59  ;;  %v590_v10 = vpop.f32.mrb[15].mxu1 }
 0x16b   : > { %v1157_v11 = vpack.c.bf16 %v693_v8, %v692_v50  ;;  %v675_v12 = vsel %vm611_vm6, %v511_v54, %v643_v3  ;;  %v691_v13 = vsel %vm627_vm7, %v575_v58, %v659_v4  ;;  %v596_v14 = vadd.f32 %v1254_v56, %v1739_v24 }
 0x16c   : > { %1173 = vst [vmem:[%s1755_s24 + $0x28] sm:$0xff] %v1117_v7   ;;  %v1112_v15 = vpack.c.bf16 %v675_v12, %v674_v62  ;;  %v1152_v16 = vpack.c.bf16 %v691_v13, %v690_v6  ;;  %vm616_vm8 = vcmp.gt.f32.partialorder %v532_v59, 0.0  ;;  %v524_v17 = vadd.f32 %v1739_v24, %v523_v60 }
 0x16d   : > { %1181 = vst [vmem:[%s1755_s24 + $0x68] sm:$0xff] %v1157_v11   ;;  %vm632_vm9 = vcmp.gt.f32.partialorder %v596_v14, 0.0  ;;  %v664_v18 = vmul.f32 0.1, %v596_v14  ;;  %v588_v19 = vadd.f32 %v1739_v24, %v587_v61  ;;  %v535_v20 = vadd.f32 %v1239_v0, %v1739_v24 }
 0x16e   : > { %1172 = vst [vmem:[%s1755_s24 + $0x20] sm:$0xff] %v1112_v15   ;;  %1180 = vst [vmem:[%s1755_s24 + $0x60] sm:$0xff] %v1152_v16   ;;  %v646_v21 = vmul.f32 0.1, %v524_v17  ;;  %v599_v22 = vadd.f32 %v1255_v1, %v1739_v24  ;;  %v527_v23 = vadd.f32 %v1739_v24, %v526_v5  ;;  %v680_v25 = vsel %vm616_vm8, %v532_v59, %v648_v9 }
 0x16f   : > { %vm614_vm10 = vcmp.gt.f32.partialorder %v524_v17, 0.0  ;;  %vm617_vm11 = vcmp.gt.f32.partialorder %v535_v20, 0.0  ;;  %v696_v26 = vsel %vm632_vm9, %v596_v14, %v664_v18  ;;  %v649_v27 = vmul.f32 0.1, %v535_v20 }
 0x170   : > { %vm633_vm12 = vcmp.gt.f32.partialorder %v599_v22, 0.0  ;;  %v665_v28 = vmul.f32 0.1, %v599_v22  ;;  %vm630_vm13 = vcmp.gt.f32.partialorder %v588_v19, 0.0  ;;  %vm615_vm14 = vcmp.gt.f32.partialorder %v527_v23, 0.0 }
 0x171   : > { %v647_v29 = vmul.f32 0.1, %v527_v23  ;;  %v591_v30 = vadd.f32 %v1739_v24, %v590_v10  ;;  %v678_v31 = vsel %vm614_vm10, %v524_v17, %v646_v21  ;;  %v662_v32 = vmul.f32 0.1, %v588_v19 }
 0x172   : > { %v681_v33 = vsel %vm617_vm11, %v535_v20, %v649_v27  ;;  %v697_v34 = vsel %vm633_vm12, %v599_v22, %v665_v28 }
 0x173   : > { %v1127_v35 = vpack.c.bf16 %v681_v33, %v680_v25  ;;  %v1167_v36 = vpack.c.bf16 %v697_v34, %v696_v26  ;;  %v679_v37 = vsel %vm615_vm14, %v527_v23, %v647_v29  ;;  %vm631_vm15 = vcmp.gt.f32.partialorder %v591_v30, 0.0 }
 0x174   : > { %v1122_v38 = vpack.c.bf16 %v679_v37, %v678_v31  ;;  %v663_v39 = vmul.f32 0.1, %v591_v30  ;;  %v694_v24 = vsel %vm630_vm13, %v588_v19, %v662_v32 }
 0x175   : > { %1175 = vst [vmem:[%s1755_s24 + $0x38] sm:$0xff] %v1127_v35   ;;  %1183 = vst [vmem:[%s1755_s24 + $0x78] sm:$0xff] %v1167_v36  }
 0x176   : > { %1174 = vst [vmem:[%s1755_s24 + $0x30] sm:$0xff] %v1122_v38   ;;  %v695_v40 = vsel %vm631_vm15, %v591_v30, %v663_v39 }
 0x177   : > { %v1162_v41 = vpack.c.bf16 %v695_v40, %v694_v24 }
 0x179   : > { %1182 = vst [vmem:[%s1755_s24 + $0x70] sm:$0xff] %v1162_v41  }
 0x17a   : > { %1444 = shalt.err (!%p1441_p5)
}
 0x17b   : > { %s1445_s6 = scalar_lea.hbm %s1803_s25, 2048  ;;  %s1449_s19 = scalar_lea.hbm %s1858_s3, 4096 }
 0x17c   : > { %p1446_p9 = scmp.ne.s32.totalorder %s1803_s25, %s1445_s6  ;;  %p1450_p3 = scmp.lt.u32.totalorder %s1803_s25, %s1858_s3 }
 0x17d   : > { %p1451_p7 = scmp.lt.u32.totalorder %s1449_s19, %s1445_s6  ;;  %p1453_p4 = scmp.lt.u32.totalorder %s1445_s6, %s1803_s25 }
 0x17e   : > { %p1447_p1 = pnand %p1446_p9, %p1645_p10 }
 0x17f   : > { %p1452_p13 = por %p1451_p7, %p1450_p3 }
 0x180   : > { %p1448_p2 = pneg %p1447_p1 }
 0x181   : > { %p1454_p6 = por %p1453_p4, %p1452_p13 }
 0x183   : > { %p1455_p8 = pnand %p1454_p6, %p1448_p2 }
 0x185   : > { %1458 = shalt.err (!%p1455_p8)
}
 0x186   : > { %s1524_s24 = smov 64   ;;  %s1525_s10 = smov 4  }
 0x187   : > { %1278 = dma.vmem_to_hbm [thread:$0]  (%p1645_p10), %s1805_s11, 2048, %s1803_s25, %s859_s15, %s1524_s24, %s1524_s24, %s1525_s10  }
 0x188 PF: > { %s888_s9 = sand.u32 1, %s1497_s12   ;;  %p1876_p12 = scmp.ne.s32.totalorder %s1866_s23, 0 }
 0x189   : > { %p1877_p11 = scmp.ge.s32.totalorder %s1517_s17, 2  ;;  %s889_s18 = scalar_lea.sflag [#allocation4], %s888_s9 }
 0x18b   : > { %p1289_p0 = pnand %p1877_p11, %p1876_p12 }
 0x18d   : > { %1492 = dma.done.wait (!%p1289_p0), %s889_s18, 2048  }
 0x18e   : > { %1494 = vsyncadd (!%p1289_p0), %s889_s18, 4294965248  ;;  %s20_s17 = sadd.s32 1, %s1517_s17   ;;  %s1878_s12 = smov %s1501_s13 }
 0x18f   : > { %p17_p5 = scmp.ge.s32.totalorder %s20_s17, 4   ;;  %s1879_s13 = smov %s1505_s14 }
 0x190   : > { %s1880_s14 = smov %s1654_s5  ;;  %s1881_s15 = smov %s1513_s16 }
 0x191   : > { %s1882_s16 = smov %s1884_s28  ;;  %19 = sbr.rel (!%p17_p5) target bundleno = 7 (0x7), region = 85 }
 0x198   :  { %894 = vsyncpa [#allocation3], 1 }
 0x199   :  { %896 = vsyncpa [#allocation3 + $0x1], 1 }
 0x19a   :  { %897 = vsyncpa [#allocation6], 1 }
 0x19b   :  { %898 = vsyncpa [#allocation4], 1 }
 0x19c   :  { %900 = vsyncpa [#allocation4 + $0x1], 1 }

</bundles_post_ra>
